<compile_context>
chip_gen: v7x
topology: tpu7x:2x2x1
jax: 0.10.0
libtpu: 0.0.40
codegen_flags: <defaults>
</compile_context>

<pallas_src>
import functools

import jax
import jax.numpy as jnp
from jax import lax
from jax.experimental import pallas as pl
from jax.experimental.pallas import tpu as pltpu


def _round_up(x, m):
    return (x + m - 1) // m * m


# ----------------------------------------------------------------------------
# Tiled linear projection kernel:  y = x @ W + b      (W stored as [in, out])
# Grid = (M/tm, N/tn, K/tk); fp32 accumulator lives in VMEM scratch; bias add
# is fused into the K-axis finalize.
# ----------------------------------------------------------------------------
def _linear_kernel(x_ref, w_ref, b_ref, o_ref, acc_ref):
    @pl.when(pl.program_id(2) == 0)
    def _init():
        acc_ref[...] = jnp.zeros_like(acc_ref)

    acc_ref[...] += jnp.dot(
        x_ref[...], w_ref[...], preferred_element_type=jnp.float32
    )

    @pl.when(pl.program_id(2) == pl.num_programs(2) - 1)
    def _finalize():
        o_ref[...] = (acc_ref[...] + b_ref[...].astype(jnp.float32)).astype(o_ref.dtype)


def linear(x2d, w, b, *, tm=512, tn=512, tk=1024):
    """x2d: [M, Din], w: [Din, Dout], b: [Dout] -> [M, Dout]."""
    M, K = x2d.shape
    K2, N = w.shape
    assert K == K2

    # Tile sizes: MXU/lane friendly, but never larger than the (aligned) problem.
    tm = min(tm, _round_up(M, 8))      # sublane-aligned
    tn = min(tn, _round_up(N, 128))    # lane-aligned
    tk = min(tk, _round_up(K, 128))    # lane-aligned

    Mp, Np, Kp = _round_up(M, tm), _round_up(N, tn), _round_up(K, tk)
    xp = x2d if (Mp == M and Kp == K) else jnp.pad(x2d, ((0, Mp - M), (0, Kp - K)))
    wp = w if (Kp == K and Np == N) else jnp.pad(w, ((0, Kp - K), (0, Np - N)))
    bp = (b if Np == N else jnp.pad(b, (0, Np - N))).reshape(1, Np)

    grid = (Mp // tm, Np // tn, Kp // tk)
    out = pl.pallas_call(
        _linear_kernel,
        grid=grid,
        out_shape=jax.ShapeDtypeStruct((Mp, Np), x2d.dtype),
        in_specs=[
            pl.BlockSpec((tm, tk), lambda i, j, k: (i, k)),
            pl.BlockSpec((tk, tn), lambda i, j, k: (k, j)),
            pl.BlockSpec((1, tn), lambda i, j, k: (0, j)),
        ],
        out_specs=pl.BlockSpec((tm, tn), lambda i, j, k: (i, j)),
        scratch_shapes=[pltpu.VMEM((tm, tn), jnp.float32)],
        compiler_params=pltpu.CompilerParams(
            dimension_semantics=("parallel", "parallel", "arbitrary")
        ),
    )(xp, wp, bp)

    if Mp != M or Np != N:
        out = out[:M, :N]
    return out


# ----------------------------------------------------------------------------
# Attention kernel.  One grid step = one (batch, head, q-tile).
# Refs (squeezed): q [tq, E], k [Lk, E], v [Lk, Ev]
# Outputs:         o [tq, Ev]  (input dtype), attn [tq, Lk] (float32)
# QK^T via dot_general on the last axes (no k.T copy); 1/sqrt(E) applied to the
# small q tile; softmax in f32; the weights are cast once to the value dtype for
# the AV matmul and stored as f32 for the attn output.
# ----------------------------------------------------------------------------
def _mha_kernel(q_ref, k_ref, v_ref, o_ref, attn_ref, *, scale):
    q = q_ref[...] * scale                                      # [tq, E]
    scores = lax.dot_general(
        q, k_ref[...], (((1,), (1,)), ((), ())),
        preferred_element_type=jnp.float32,
    )                                                           # [tq, Lk] f32
    m = jnp.max(scores, axis=-1, keepdims=True)
    e = jnp.exp(scores - m)
    s = jnp.sum(e, axis=-1, keepdims=True)
    # attn is a returned output compared at tight tolerance -> exact reciprocal.
    attn = e * pl.reciprocal(s, approx=False)                   # [tq, Lk] f32
    out = jnp.dot(attn.astype(v_ref.dtype), v_ref[...],
                  preferred_element_type=jnp.float32)           # [tq, Ev]
    o_ref[...] = out.astype(o_ref.dtype)
    attn_ref[...] = attn


def _pick_tq(tq, Lq, Lk, E, Ev, itemsize, budget=12 << 20):
    """Shrink the q-tile until the per-head double-buffered blocks fit a
    conservative VMEM budget (v5e's 16 MiB scoped default, with headroom)."""
    tq = min(tq, _round_up(Lq, 8))
    Ep, Evp, Lkp = _round_up(E, 128), _round_up(Ev, 128), _round_up(Lk, 128)
    fixed = 2 * (Lk * Ep + Lk * Evp) * itemsize                 # K + V blocks
    def var(t):
        return (2 * t * (Ep + Evp) * itemsize      # q in + out blocks
                + 2 * t * Lkp * 4                  # attn output block (f32)
                + 2 * t * Lkp * 4)                 # in-kernel scores/exp temporaries
    while tq > 8 and fixed + var(tq) > budget:
        tq = max(8, tq // 2)
    # TODO(synk): if K/V alone exceed the budget (very long Lk), tile Lk with an
    # online-softmax accumulator (only possible when attn weights are not returned).
    return tq


def multi_head_attention(q4, k4, v4, *, tq=256):
    """q4: [B, Lq, H, E], k4: [B, Lk, H, E], v4: [B, Lk, H, Ev]
    -> out [B, Lq, H, Ev] (input dtype), attn [B, H, Lq, Lk] (float32)."""
    B, Lq, H, E = q4.shape
    Lk = k4.shape[1]
    Ev = v4.shape[3]
    scale = 1.0 / (E ** 0.5)

    tq = _pick_tq(tq, Lq, Lk, E, Ev, q4.dtype.itemsize)
    Lqp = _round_up(Lq, tq)
    if Lqp != Lq:
        q4 = jnp.pad(q4, ((0, 0), (0, Lqp - Lq), (0, 0), (0, 0)))
    # NOTE: Lk is never padded, so no -inf masking of key columns is needed.

    grid = (B, H, Lqp // tq)   # qi innermost -> K/V blocks stay resident across q-tiles
    out, attn = pl.pallas_call(
        functools.partial(_mha_kernel, scale=scale),
        grid=grid,
        out_shape=(
            jax.ShapeDtypeStruct((B, Lqp, H, Ev), q4.dtype),
            jax.ShapeDtypeStruct((B, H, Lqp, Lk), jnp.float32),
        ),
        in_specs=[
            pl.BlockSpec((None, tq, None, E), lambda b, h, qi: (b, qi, h, 0)),
            pl.BlockSpec((None, Lk, None, E), lambda b, h, qi: (b, 0, h, 0)),
            pl.BlockSpec((None, Lk, None, Ev), lambda b, h, qi: (b, 0, h, 0)),
        ],
        out_specs=(
            pl.BlockSpec((None, tq, None, Ev), lambda b, h, qi: (b, qi, h, 0)),
            pl.BlockSpec((None, None, tq, Lk), lambda b, h, qi: (b, h, qi, 0)),
        ),
        compiler_params=pltpu.CompilerParams(
            dimension_semantics=("parallel", "parallel", "arbitrary")
        ),
    )(q4, k4, v4)

    if Lqp != Lq:
        out = out[:, :Lq]
        attn = attn[:, :, :Lq, :]
    return out, attn


def multi_head_attention_fused(qkv5, *, tq=256):
    """Self-attention on a fused QKV tensor qkv5: [B, L, 3, H, E]
    -> out [B, L, H, E] (input dtype), attn [B, H, L, L] (float32)."""
    B, L, three, H, E = qkv5.shape
    assert three == 3
    scale = 1.0 / (E ** 0.5)

    tq = _pick_tq(tq, L, L, E, E, qkv5.dtype.itemsize)
    Lp = _round_up(L, tq)
    if Lp != L:
        qkv5 = jnp.pad(qkv5, ((0, 0), (0, Lp - L), (0, 0), (0, 0), (0, 0)))

    grid = (B, H, Lp // tq)
    out, attn = pl.pallas_call(
        functools.partial(_mha_kernel, scale=scale),
        grid=grid,
        out_shape=(
            jax.ShapeDtypeStruct((B, Lp, H, E), qkv5.dtype),
            jax.ShapeDtypeStruct((B, H, Lp, L), jnp.float32),
        ),
        in_specs=[
            pl.BlockSpec((None, tq, None, None, E), lambda b, h, qi: (b, qi, 0, h, 0)),
            # K/V windows cover only the first (unpadded) L rows -> no key masking.
            pl.BlockSpec((None, L, None, None, E), lambda b, h, qi: (b, 0, 1, h, 0)),
            pl.BlockSpec((None, L, None, None, E), lambda b, h, qi: (b, 0, 2, h, 0)),
        ],
        out_specs=(
            pl.BlockSpec((None, tq, None, E), lambda b, h, qi: (b, qi, h, 0)),
            pl.BlockSpec((None, None, tq, L), lambda b, h, qi: (b, h, qi, 0)),
        ),
        compiler_params=pltpu.CompilerParams(
            dimension_semantics=("parallel", "parallel", "arbitrary")
        ),
    )(qkv5, qkv5, qkv5)

    if Lp != L:
        out = out[:, :L]
        attn = attn[:, :, :L, :]
    return out, attn


# ----------------------------------------------------------------------------
# AttentionLayer forward  (matches the PyTorch module semantics)
# ----------------------------------------------------------------------------
def attention_layer_forward(params, queries, keys, values, num_heads,
                            attention_mask=None, tau=None, delta=None, *, attn_tq=256):
    # TODO(synk): only the default softmax-attention path (attention_mask = tau =
    # delta = None) of the pluggable `attention` callable is implemented.
    assert attention_mask is None and tau is None and delta is None

    B, Lq, D = queries.shape
    _, Lk, _ = keys.shape
    H = num_heads
    E = params["wq"].shape[1] // H
    Ev = params["wv"].shape[1] // H

    if (queries is keys) and (keys is values) and (E == Ev):
        # Self-attention: fused QKV projection (one HBM pass over the activations),
        # consumed directly by the attention kernel in [B, L, 3, H, E] layout.
        wqkv = jnp.concatenate([params["wq"], params["wk"], params["wv"]], axis=1)
        bqkv = jnp.concatenate([params["bq"], params["bk"], params["bv"]], axis=0)
        qkv = linear(queries.reshape(B * Lq, D), wqkv, bqkv)
        qkv5 = qkv.reshape(B, Lq, 3, H, E)        # pure minor-dim split, no transpose
        out, attn = multi_head_attention_fused(qkv5, tq=attn_tq)
    else:
        q = linear(queries.reshape(B * Lq, D), params["wq"], params["bq"])
        k = linear(keys.reshape(B * Lk, D), params["wk"], params["bk"])
        v = linear(values.reshape(B * Lk, D), params["wv"], params["bv"])
        q4 = q.reshape(B, Lq, H, E)
        k4 = k.reshape(B, Lk, H, E)
        v4 = v.reshape(B, Lk, H, Ev)
        out, attn = multi_head_attention(q4, k4, v4, tq=attn_tq)

    # [B, Lq, H, Ev] -> [B*Lq, H*Ev]: contiguous merge, no transpose.
    out2d = out.reshape(B * Lq, H * Ev)
    y = linear(out2d, params["wo"], params["bo"])
    return y.reshape(B, Lq, -1), attn


# ----------------------------------------------------------------------------
# Deterministic parameter init (shapes from the module __init__).
# Weights stored as [in, out] (transpose of torch's nn.Linear.weight).
# ----------------------------------------------------------------------------
def init_params(key, model_dim, num_heads, keys_dim=None, values_dim=None):
    keys_dim = keys_dim or model_dim // num_heads
    values_dim = values_dim or model_dim // num_heads
    ks = jax.random.split(key, 8)
    s = 0.05
    return {
        "wq": s * jax.random.normal(ks[0], (model_dim, keys_dim * num_heads), jnp.float32),
        "bq": s * jax.random.normal(ks[1], (keys_dim * num_heads,), jnp.float32),
        "wk": s * jax.random.normal(ks[2], (model_dim, keys_dim * num_heads), jnp.float32),
        "bk": s * jax.random.normal(ks[3], (keys_dim * num_heads,), jnp.float32),
        "wv": s * jax.random.normal(ks[4], (model_dim, values_dim * num_heads), jnp.float32),
        "bv": s * jax.random.normal(ks[5], (values_dim * num_heads,), jnp.float32),
        "wo": s * jax.random.normal(ks[6], (values_dim * num_heads, model_dim), jnp.float32),
        "bo": s * jax.random.normal(ks[7], (model_dim,), jnp.float32),
    }


# ----------------------------------------------------------------------------
# Pure-JAX reference (correctness check only)
# ----------------------------------------------------------------------------
def reference_forward(params, queries, keys, values, num_heads):
    B, Lq, D = queries.shape
    _, Lk, _ = keys.shape
    q = queries @ params["wq"] + params["bq"]
    k = keys @ params["wk"] + params["bk"]
    v = values @ params["wv"] + params["bv"]
    E = q.shape[-1] // num_heads
    Ev = v.shape[-1] // num_heads
    qh = q.reshape(B, Lq, num_heads, E)
    kh = k.reshape(B, Lk, num_heads, E)
    vh = v.reshape(B, Lk, num_heads, Ev)
    scores = jnp.einsum("bqhe,bkhe->bhqk", qh, kh) / jnp.sqrt(jnp.float32(E))
    attn = jax.nn.softmax(scores, axis=-1)
    out = jnp.einsum("bhqk,bkhe->bqhe", attn, vh).reshape(B, Lq, num_heads * Ev)
    y = out @ params["wo"] + params["bo"]
    return y, attn


if __name__ == "__main__":
    key = jax.random.PRNGKey(0)

    # --- Test 1: distinct q/k/v tensors (cross-attention style) -> unfused path.
    B, L, D, H = 2, 8, 32, 4   # batch, seq, model_dim, num_heads
    kq, kk, kv, kp = jax.random.split(key, 4)
    queries = jax.random.normal(kq, (B, L, D), jnp.float32)
    keys_in = jax.random.normal(kk, (B, L, D), jnp.float32)
    values_in = jax.random.normal(kv, (B, L, D), jnp.float32)
    params = init_params(kp, D, H)

    out, attn = attention_layer_forward(params, queries, keys_in, values_in, H)
    out = jax.block_until_ready(out)
    attn = jax.block_until_ready(attn)
    ref_out, ref_attn = reference_forward(params, queries, keys_in, values_in, H)
    assert out.shape == (B, L, D) and attn.shape == (B, H, L, L)
    assert jnp.allclose(out, ref_out, atol=2e-4, rtol=2e-4)
    assert jnp.allclose(attn, ref_attn, atol=2e-4, rtol=2e-4)

    # --- Test 2: self-attention (same tensor) -> fused-QKV path; L is not a
    # multiple of the q-tile, so the padding + multi-q-tile grid path runs too.
    B2, L2, D2, H2 = 2, 12, 64, 4
    kx, kp2 = jax.random.split(kp)
    x = jax.random.normal(kx, (B2, L2, D2), jnp.float32)
    params2 = init_params(kp2, D2, H2)
    out2, attn2 = attention_layer_forward(params2, x, x, x, H2, attn_tq=8)
    out2 = jax.block_until_ready(out2)
    attn2 = jax.block_until_ready(attn2)
    ref_out2, ref_attn2 = reference_forward(params2, x, x, x, H2)
    assert out2.shape == (B2, L2, D2) and attn2.shape == (B2, H2, L2, L2)
    assert jnp.allclose(out2, ref_out2, atol=2e-4, rtol=2e-4)
    assert jnp.allclose(attn2, ref_attn2, atol=2e-4, rtol=2e-4)

    print("KERNEL_OK")
</pallas_src>

<mosaic_0001>
module attributes {stable_mosaic.version = 11 : i64} {
  func.func @_linear_kernel(%arg0: i32, %arg1: i32, %arg2: i32, %arg3: memref<16x128xf32, #tpu.memory_space<vmem>>, %arg4: memref<128x128xf32, #tpu.memory_space<vmem>>, %arg5: memref<1x128xf32, #tpu.memory_space<vmem>>, %arg6: memref<16x128xf32, #tpu.memory_space<vmem>>, %arg7: memref<16x128xf32, #tpu.memory_space<vmem>>) attributes {dimension_semantics = [#tpu.dimension_semantics<parallel>, #tpu.dimension_semantics<parallel>, #tpu.dimension_semantics<arbitrary>], iteration_bounds = array<i64: 1, 1, 1>, scalar_prefetch = 0 : i64, scratch_operands = 1 : i64, tpu.core_type = #tpu.core_type<tc>, window_params = [{transform_indices = @transform_0, window_bounds = array<i64: 16, 128>}, {transform_indices = @transform_1, window_bounds = array<i64: 128, 128>}, {transform_indices = @transform_2, window_bounds = array<i64: 1, 128>}, {transform_indices = @transform_3, window_bounds = array<i64: 16, 128>}]} {
    %c0_i32 = arith.constant 0 : i32
    %0 = arith.cmpi eq, %arg2, %c0_i32 : i32
    %1 = arith.extui %0 : i1 to i32
    %c0_i32_0 = arith.constant 0 : i32
    %2 = arith.cmpi ne, %1, %c0_i32_0 : i32
    scf.if %2 {
      %cst_10 = arith.constant 0.000000e+00 : f32
      %12 = vector.broadcast %cst_10 : f32 to vector<16x128xf32>
      %c0_11 = arith.constant 0 : index
      %c0_12 = arith.constant 0 : index
      %13 = vector.load %arg7[%c0_11, %c0_12] : memref<16x128xf32, #tpu.memory_space<vmem>>, vector<16x128xf32>
      tpu.vector_store %arg7[%c0_11, %c0_12], %12 {strides = array<i32>} : memref<16x128xf32, #tpu.memory_space<vmem>>, vector<16x128xf32>,
    } else {
    }
    %c0 = arith.constant 0 : index
    %c0_1 = arith.constant 0 : index
    %3 = vector.load %arg7[%c0, %c0_1] : memref<16x128xf32, #tpu.memory_space<vmem>>, vector<16x128xf32>
    %c0_2 = arith.constant 0 : index
    %c0_3 = arith.constant 0 : index
    %4 = vector.load %arg3[%c0_2, %c0_3] : memref<16x128xf32, #tpu.memory_space<vmem>>, vector<16x128xf32>
    %c0_4 = arith.constant 0 : index
    %c0_5 = arith.constant 0 : index
    %5 = vector.load %arg4[%c0_4, %c0_5] : memref<128x128xf32, #tpu.memory_space<vmem>>, vector<128x128xf32>
    %cst = arith.constant dense<0.000000e+00> : vector<16x128xf32>
    %6 = tpu.matmul %4, %5, %cst {dimension_numbers = #tpu.dot_dimension_numbers<[1], [0], [0], [1], [0, 0, 1, 1], [], []>} : vector<16x128xf32>, vector<128x128xf32>, vector<16x128xf32> -> vector<16x128xf32>
    %7 = arith.addf %3, %6 : vector<16x128xf32>
    %c0_6 = arith.constant 0 : index
    %c0_7 = arith.constant 0 : index
    %8 = vector.load %arg7[%c0_6, %c0_7] : memref<16x128xf32, #tpu.memory_space<vmem>>, vector<16x128xf32>
    tpu.vector_store %arg7[%c0_6, %c0_7], %7 {strides = array<i32>} : memref<16x128xf32, #tpu.memory_space<vmem>>, vector<16x128xf32>,
    %c0_i32_8 = arith.constant 0 : i32
    %9 = arith.cmpi eq, %arg2, %c0_i32_8 : i32
    %10 = arith.extui %9 : i1 to i32
    %c0_i32_9 = arith.constant 0 : i32
    %11 = arith.cmpi ne, %10, %c0_i32_9 : i32
    scf.if %11 {
      %c0_10 = arith.constant 0 : index
      %c0_11 = arith.constant 0 : index
      %12 = vector.load %arg7[%c0_10, %c0_11] : memref<16x128xf32, #tpu.memory_space<vmem>>, vector<16x128xf32>
      %c0_12 = arith.constant 0 : index
      %c0_13 = arith.constant 0 : index
      %13 = vector.load %arg5[%c0_12, %c0_13] : memref<1x128xf32, #tpu.memory_space<vmem>>, vector<1x128xf32>
      %14 = vector.broadcast %13 : vector<1x128xf32> to vector<16x128xf32>
      %15 = arith.addf %12, %14 : vector<16x128xf32>
      %c0_14 = arith.constant 0 : index
      %c0_15 = arith.constant 0 : index
      %16 = vector.load %arg6[%c0_14, %c0_15] : memref<16x128xf32, #tpu.memory_space<vmem>>, vector<16x128xf32>
      tpu.vector_store %arg6[%c0_14, %c0_15], %15 {strides = array<i32>} : memref<16x128xf32, #tpu.memory_space<vmem>>, vector<16x128xf32>,
    } else {
    }
    return
  }
  func.func @transform_0(%arg0: i32, %arg1: i32, %arg2: i32) -> (i32, i32) {
    %c0_i32 = arith.constant 0 : i32
    return %arg0, %arg2 : i32, i32
  }
  func.func @transform_1(%arg0: i32, %arg1: i32, %arg2: i32) -> (i32, i32) {
    %c0_i32 = arith.constant 0 : i32
    return %arg2, %arg1 : i32, i32
  }
  func.func @transform_2(%arg0: i32, %arg1: i32, %arg2: i32) -> (i32, i32) {
    %c0_i32 = arith.constant 0 : i32
    %c0_i32_0 = arith.constant 0 : i32
    return %c0_i32, %arg1 : i32, i32
  }
  func.func @transform_3(%arg0: i32, %arg1: i32, %arg2: i32) -> (i32, i32) {
    %c0_i32 = arith.constant 0 : i32
    return %arg0, %arg1 : i32, i32
  }
}

</mosaic_0001>

<bundles_post_ra>
// kernel: tpu_custom_call.1
= control target key start
LH: loop header
LB: loop body
LE: loop exit
PB: predicated region body
PF: predicated region fallthrough
CT: control target
= control target key end

     0   :  { %8 = vsyncpa [#allocation4], 0  ;;  %s418_s0 = inlined_call_operand.hbm [shape: f32[16,128], index: 0, kind: input, shape index: {}]   ;;  %s419_s1 = inlined_call_operand.hbm [shape: f32[128,128], index: 1, kind: input, shape index: {}]   ;;  %s420_s2 = inlined_call_operand.vmem [shape: f32[1,128], index: 2, kind: input, shape index: {}]   ;;  %s421_s3 = inlined_call_operand.hbm [shape: f32[16,128], index: 3, kind: output, shape index: {}]  }
   0x1   :  { %9 = vsyncpa [#allocation7], 0 }
   0x2   :  { %10 = vsyncpa [#allocation5], 0  ;;  %s345_s12 = smov [#allocation3]   ;;  %s273_s16 = scalar_lea.hbm %s418_s0, 256 }
   0x3   :  { %s16_s13 = sshll.u32 %s345_s12, 4  ;;  %p274_p0 = scmp.ne.s32.totalorder %s418_s0, %s273_s16  ;;  %s17_s13 = int_to_ptr.vmem [resolvable:$true] %s16_s13 }
   0x4   :  { %p277_p1 = scmp.lt.u32.totalorder %s273_s16, %s418_s0 }
   0x6   :  { %p279_p2 = pnand %p277_p1, %p274_p0 }
   0x8   :  { %282 = shalt.err (!%p279_p2)
}
   0x9   :  { %s283_s21 = scalar_lea.vmem %s17_s13, 256  ;;  %p288_p4 = scmp.lt.s32.totalorder %s17_s13, %s17_s13 }
   0xa   :  { %p284_p3 = scmp.ne.s32.totalorder %s17_s13, %s283_s21  ;;  %p289_p5 = scmp.lt.s32.totalorder %s283_s21, %s283_s21 }
   0xc   :  { %p290_p6 = por %p289_p5, %p288_p4 }
   0xe   :  { %p291_p7 = pnand %p290_p6, %p284_p3 }
  0x10   :  { %294 = shalt.err (!%p291_p7)
}
  0x11   :  { %s346_s22 = smov 128   ;;  %s347_s23 = smov 8  }
  0x12   :  { %22 = dma.hbm_to_vmem [thread:$0]  %s418_s0, 256, %s17_s13, [#allocation4], %s346_s22, %s346_s22, %s347_s23  }
  0x13   :  { %s348_s26 = smov [#allocation6]   ;;  %s295_s30 = scalar_lea.hbm %s419_s1, 2048 }
  0x14   :  { %s28_s27 = sshll.u32 %s348_s26, 4  ;;  %p296_p8 = scmp.ne.s32.totalorder %s419_s1, %s295_s30  ;;  %s29_s27 = int_to_ptr.vmem [resolvable:$true] %s28_s27 }
  0x15   :  { %p299_p9 = scmp.lt.u32.totalorder %s295_s30, %s419_s1 }
  0x17   :  { %p301_p10 = pnand %p299_p9, %p296_p8 }
  0x19   :  { %304 = shalt.err (!%p301_p10)
}
  0x1a   :  { %s305_s8 = scalar_lea.vmem %s29_s27, 2048  ;;  %p310_p12 = scmp.lt.s32.totalorder %s29_s27, %s29_s27 }
  0x1b   :  { %p306_p11 = scmp.ne.s32.totalorder %s29_s27, %s305_s8  ;;  %p311_p13 = scmp.lt.s32.totalorder %s305_s8, %s305_s8 }
  0x1d   :  { %p312_p0 = por %p311_p13, %p310_p12 }
  0x1f   :  { %p313_p1 = pnand %p312_p0, %p306_p11 }
  0x21   :  { %316 = shalt.err (!%p313_p1)
}
  0x22   :  { %34 = dma.hbm_to_vmem [thread:$0]  %s419_s1, 2048, %s29_s27, [#allocation7], %s346_s22, %s346_s22, %s347_s23  }
  0x23   :  { %339 = dma.done.wait [#allocation4], 256  }
  0x24   :  { %340 = vsyncadd [#allocation4], 4294967040 }
  0x25   :  { %341 = dma.done.wait [#allocation7], 2048  }
  0x26   :  { %342 = vsyncadd [#allocation7], 4294965248  ;;  %v53_v0 = vld [vmem:[#allocation6] sm:$0xff]  ;;  %v54_v1 = vld [vmem:[#allocation6 + $0x8] sm:$0xff]  ;;  %s349_s11 = smov [#allocation8]  }
  0x27   :  { %v55_v2 = vld [vmem:[#allocation6 + $0x10] sm:$0xff]  ;;  %v236_v3 = vpack.c.bf16 %v54_v1, %v53_v0  ;;  %v56_v4 = vld [vmem:[#allocation6 + $0x18] sm:$0xff]  ;;  %v57_v6 = vld [vmem:[#allocation6 + $0x20] sm:$0xff]  ;;  %s169_s12 = sshll.u32 %s349_s11, 4  ;;  %s170_s12 = int_to_ptr.vmem [resolvable:$true] %s169_s12 }
  0x28   :  { %v240_v5 = vpack.c.bf16 %v56_v4, %v55_v2  ;;  %v58_v7 = vld [vmem:[#allocation6 + $0x28] sm:$0xff]  ;;  %v51_v9 = vld [vmem:[#allocation3] sm:$0xff]  ;;  %v60_v11 = vld [vmem:[#allocation6 + $0x38] sm:$0xff]  ;;  %s317_s13 = scalar_lea.vmem %s170_s12, 256  ;;  %p322_p3 = scmp.lt.s32.totalorder %s170_s12, %s170_s12 }
  0x29   :  { %237 = vmatprep.subr.bf16.mxu0 %v236_v3  ;;  %v244_v8 = vpack.c.bf16 %v58_v7, %v57_v6  ;;  %v59_v10 = vld [vmem:[#allocation6 + $0x30] sm:$0xff]  ;;  %233 = vmatprep.mubr.f32.mxu0 %v51_v9  ;;  %v61_v13 = vld [vmem:[#allocation6 + $0x40] sm:$0xff]  ;;  %v62_v14 = vld [vmem:[#allocation6 + $0x48] sm:$0xff]  ;;  %p318_p2 = scmp.ne.s32.totalorder %s170_s12, %s317_s13  ;;  %p323_p4 = scmp.lt.s32.totalorder %s317_s13, %s317_s13 }
  0x2a   :  { %239 = vmatpush3.bf16.msra.mxu0 %v236_v3  ;;  %v248_v12 = vpack.c.bf16 %v60_v11, %v59_v10  ;;  %v252_v15 = vpack.c.bf16 %v62_v14, %v61_v13  ;;  %v63_v16 = vld [vmem:[#allocation6 + $0x50] sm:$0xff]  ;;  %v64_v17 = vld [vmem:[#allocation6 + $0x58] sm:$0xff]  ;;  %v65_v19 = vld [vmem:[#allocation6 + $0x60] sm:$0xff] }
  0x2b   :  { %241 = vmatprep.subr.bf16.mxu0 %v240_v5  ;;  %v256_v18 = vpack.c.bf16 %v64_v17, %v63_v16  ;;  %v66_v20 = vld [vmem:[#allocation6 + $0x68] sm:$0xff]  ;;  %v67_v22 = vld [vmem:[#allocation6 + $0x70] sm:$0xff]  ;;  %v68_v23 = vld [vmem:[#allocation6 + $0x78] sm:$0xff]  ;;  %p324_p5 = por %p323_p4, %p322_p3 }
  0x2c   :  { %v260_v21 = vpack.c.bf16 %v66_v20, %v65_v19  ;;  %v264_v24 = vpack.c.bf16 %v68_v23, %v67_v22  ;;  %v52_v25 = vld [vmem:[#allocation3 + $0x8] sm:$0xff]  ;;  %v182_v26 = vld [vmem:[%s420_s2] ss:$0 sm:$0xff] }
  0x2d   :  { %p325_p6 = pnand %p324_p5, %p318_p2 }
  0x2e   :  { %243 = vmatpush3.bf16.msra.mxu0 %v240_v5 }
  0x2f   :  { %245 = vmatprep.subr.bf16.mxu0 %v244_v8 }
  0x32   :  { %247 = vmatpush3.bf16.msra.mxu0 %v244_v8 }
  0x33   :  { %249 = vmatprep.subr.bf16.mxu0 %v248_v12 }
  0x36   :  { %251 = vmatpush3.bf16.msra.mxu0 %v248_v12 }
  0x37   :  { %253 = vmatprep.subr.bf16.mxu0 %v252_v15 }
  0x3a   :  { %255 = vmatpush3.bf16.msra.mxu0 %v252_v15 }
  0x3b   :  { %257 = vmatprep.subr.bf16.mxu0 %v256_v18 }
  0x3e   :  { %259 = vmatpush3.bf16.msra.mxu0 %v256_v18 }
  0x3f   :  { %261 = vmatprep.subr.bf16.mxu0 %v260_v21 }
  0x42   :  { %263 = vmatpush3.bf16.msra.mxu0 %v260_v21 }
  0x43   :  { %265 = vmatprep.subr.bf16.mxu0 %v264_v24 }
  0x46   :  { %267 = vmatpush3.bf16.msra.mxu0 %v264_v24 }
  0x49   :  { %234 = vmatmul.mubr.f32.vlgmr.msra.gmra.mrb[0].mxu0 %v52_v25 }
 0x11c   :  { %v235_v27 = vpop.f32.mrb[0].mxu0 }
 0x11d   :  { %v161_v28 = vadd.f32 %v235_v27, %v182_v26  ;;  %v135_v29 = vpop.f32.mrb[1].mxu0 }
 0x11e   :  { %v160_v30 = vadd.f32 %v182_v26, %v135_v29 }
 0x11f   :  { %163 = vst [vmem:[#allocation8 + $0x8] sm:$0xff] %v161_v28 }
 0x120   :  { %162 = vst [vmem:[#allocation8] sm:$0xff] %v160_v30 }
 0x121   :  { %328 = shalt.err (!%p325_p6)
}
 0x122   :  { %s329_s2 = scalar_lea.hbm %s421_s3, 256 }
 0x123   :  { %p330_p7 = scmp.ne.s32.totalorder %s421_s3, %s329_s2  ;;  %p333_p8 = scmp.lt.u32.totalorder %s329_s2, %s421_s3 }
 0x125   :  { %p335_p9 = pnand %p333_p8, %p330_p7 }
 0x127   :  { %338 = shalt.err (!%p335_p9)
}
 0x128   :  { %175 = dma.vmem_to_hbm [thread:$0]  %s170_s12, 256, %s421_s3, [#allocation5], %s346_s22, %s346_s22, %s347_s23  }
 0x129   :  { %343 = dma.done.wait [#allocation5], 256  }
 0x12a   :  { %344 = vsyncadd [#allocation5], 4294967040 }
 0x12b   :  { %179 = vsyncpa [#allocation4], 1 }
 0x12c   :  { %180 = vsyncpa [#allocation7], 1 }
 0x12d   :  { %181 = vsyncpa [#allocation5], 1 }

</bundles_post_ra>
